<compile_context>
chip_gen: v7x
topology: tpu7x:2x2x1
jax: 0.10.0
libtpu: 0.0.40
codegen_flags: <defaults>
</compile_context>

<pallas_src>
import jax
import jax.numpy as jnp
from jax.experimental import pallas as pl
from jax.experimental.pallas import tpu as pltpu


def soa_kernel(ids_ref, table_hbm, w1_ref, b1_ref, w2_hbm, b2_ref, o_ref,
               x_vmem, gather_sem, w2_vmem, w2_sem):
    """One batch tile: DMA row-gather TB rows, residual MLP, write [TB, D].

    ids_ref:   [Bp]            int32     (SMEM, scalar-prefetch)
    table_hbm: [n_classes, D]  float32   (HBM, pl.ANY)
    w1_ref:    [D, D]          bfloat16  (VMEM, resident across tiles)
    b1_ref:    [1, D]          float32
    w2_hbm:    [D, D]          bfloat16  (HBM, manual overlapped copy)
    b2_ref:    [1, D]          float32
    o_ref:     [TB, D]         float32
    """
    tb = x_vmem.shape[0]
    base = pl.program_id(0) * tb

    # Kick off the W2 HBM->VMEM transfer first; it overlaps the row gather,
    # the first matmul and the ReLU and is waited on just before the 2nd dot.
    w2_copy = pltpu.make_async_copy(w2_hbm, w2_vmem, w2_sem)
    w2_copy.start()

    # DMA row-gather: table[ids[base + r]] -> x_vmem[r].  Only the TB rows
    # consumed by this tile move from HBM (no one-hot matmul, no full-table DMA).
    for r in range(tb):  # tb is a static Python int
        pltpu.make_async_copy(
            table_hbm.at[pl.ds(ids_ref[base + r], 1), :],
            x_vmem.at[pl.ds(r, 1), :],
            gather_sem.at[r],
        ).start()
    for r in range(tb):
        pltpu.make_async_copy(
            table_hbm.at[pl.ds(0, 1), :],
            x_vmem.at[pl.ds(r, 1), :],
            gather_sem.at[r],
        ).wait()

    x = x_vmem[...]                                               # [TB, D] f32

    # Residual MLP: bf16 weights into the MXU, f32 accumulate, f32 elementwise
    # (v5e has no bf16 VPU path, so bias/ReLU/residual stay f32).
    h = jnp.dot(x.astype(jnp.bfloat16), w1_ref[...],
                preferred_element_type=jnp.float32) + b1_ref[...]
    h = jnp.maximum(h, 0.0)
    # TODO(synk): nn.Dropout(0.3) is identity at inference; training would need
    # a pltpu.prng_* mask here.

    w2_copy.wait()                                                # W2 now in VMEM
    y = jnp.dot(h.astype(jnp.bfloat16), w2_vmem[...],
                preferred_element_type=jnp.float32) + b2_ref[...]

    o_ref[...] = (x + y).astype(o_ref.dtype)


def semantic_offset_adaptor(class_ids, table, w1_bf16, b1, w2_bf16, b2, *, tile_b=8):
    """class_ids: [B] int32; table: [n_classes, D] f32; w*: [D, D] bf16; b*: [1, D] f32."""
    B = class_ids.shape[0]
    n_classes, D = table.shape

    num_tiles = pl.cdiv(B, tile_b)
    Bp = num_tiles * tile_b
    ids = class_ids.astype(jnp.int32)
    if Bp != B:
        # Padded rows gather class 0 (valid row) and are sliced off below.
        ids = jnp.pad(ids, (0, Bp - B))

    flops = 2 * Bp * 2 * D * D                       # two [TB,D]@[D,D] matmuls
    bytes_accessed = (Bp * 4                         # class ids
                      + Bp * D * 4                   # gathered table rows only
                      + 2 * D * D * 2                # w1 + w2 (bf16)
                      + 2 * D * 4                    # biases
                      + Bp * D * 4)                  # output

    out = pl.pallas_call(
        soa_kernel,
        out_shape=jax.ShapeDtypeStruct((Bp, D), jnp.float32),
        grid_spec=pltpu.PrefetchScalarGridSpec(
            num_scalar_prefetch=1,                   # class_ids -> SMEM
            grid=(num_tiles,),
            in_specs=[
                pl.BlockSpec(memory_space=pl.ANY),               # table (HBM, DMA gather)
                pl.BlockSpec((D, D), lambda i, ids: (0, 0)),     # w1 (VMEM-resident)
                pl.BlockSpec((1, D), lambda i, ids: (0, 0)),     # b1
                pl.BlockSpec(memory_space=pl.ANY),               # w2 (HBM, manual copy)
                pl.BlockSpec((1, D), lambda i, ids: (0, 0)),     # b2
            ],
            out_specs=pl.BlockSpec((tile_b, D), lambda i, ids: (i, 0)),
            scratch_shapes=[
                pltpu.VMEM((tile_b, D), jnp.float32),            # gathered activations
                pltpu.SemaphoreType.DMA((tile_b,)),              # per-row gather sems
                pltpu.VMEM((D, D), jnp.bfloat16),                # W2 staging buffer
                pltpu.SemaphoreType.DMA(()),                     # W2 sem
            ]),
        compiler_params=pltpu.CompilerParams(
            dimension_semantics=("parallel",)),                  # batch tiles independent
        cost_estimate=pl.CostEstimate(
            flops=flops, transcendentals=0, bytes_accessed=bytes_accessed),
    )(ids, table, w1_bf16, b1, w2_bf16, b2)

    return out[:B] if Bp != B else out


def model_forward(fix, part_id, class_ids, w1_bf16, b1, w2_bf16, b2):
    """Equivalent of Model.forward (inference). part_id is a static Python int.

    fix:          [5, n_classes, D] f32  frozen CLIP text features (synthetic here)
    class_ids:    [B] int32
    w1/w2 (bf16): [D, D] stored persistently in bf16 (= PyTorch weight.T)
    b1/b2:        [1, D] f32
    """
    table = fix[part_id]          # static slice, no runtime gather
    return semantic_offset_adaptor(class_ids, table, w1_bf16, b1, w2_bf16, b2)


def reference_forward_bf16(fix, part_id, class_ids, w1_bf16, b1, w2_bf16, b2):
    """Same numerics as the kernel (bf16 weights/activations into the dot, f32 acc)."""
    x = fix[part_id][class_ids]
    h = jnp.dot(x.astype(jnp.bfloat16), w1_bf16, preferred_element_type=jnp.float32) + b1
    h = jnp.maximum(h, 0.0)
    y = jnp.dot(h.astype(jnp.bfloat16), w2_bf16, preferred_element_type=jnp.float32) + b2
    return x + y


def reference_forward_f32(fix, part_id, class_ids, w1, b1, w2, b2):
    """Original full-f32 module math (loose-tolerance sanity check)."""
    x = fix[part_id][class_ids]
    h = jnp.maximum(x @ w1 + b1, 0.0)
    return x + (h @ w2 + b2)


if __name__ == "__main__":
    # Small synthetic configuration (B / D kept sublane / lane aligned: 8 / 128).
    n_parts = 5
    n_classes = 8
    embed_dim = 128          # config.n_contra_features (CLIP uses 512; small here)
    batch = 8                # len(class_ids)

    key = jax.random.PRNGKey(0)
    k_fix, k_w1, k_b1, k_w2, k_b2, k_cls = jax.random.split(key, 6)

    # "fix" plays the role of the frozen CLIP text features (deterministic synth).
    fix = jax.random.normal(k_fix, (n_parts, n_classes, embed_dim), jnp.float32)

    # nn.Linear(embed_dim, embed_dim) weights; stored as [in, out] (= weight.T).
    scale = 1.0 / jnp.sqrt(embed_dim)
    w1 = jax.random.uniform(k_w1, (embed_dim, embed_dim), jnp.float32, -scale, scale)
    b1 = jax.random.uniform(k_b1, (1, embed_dim), jnp.float32, -scale, scale)
    w2 = jax.random.uniform(k_w2, (embed_dim, embed_dim), jnp.float32, -scale, scale)
    b2 = jax.random.uniform(k_b2, (1, embed_dim), jnp.float32, -scale, scale)

    # Persist weights in bf16 ONCE at setup (no per-call cast / extra HBM traffic).
    w1_bf16 = jax.block_until_ready(w1.astype(jnp.bfloat16))
    w2_bf16 = jax.block_until_ready(w2.astype(jnp.bfloat16))

    part_id = 2
    class_ids = jax.random.randint(k_cls, (batch,), 0, n_classes, jnp.int32)

    out = model_forward(fix, part_id, class_ids, w1_bf16, b1, w2_bf16, b2)
    out = jax.block_until_ready(out)

    ref_bf16 = reference_forward_bf16(fix, part_id, class_ids, w1_bf16, b1, w2_bf16, b2)
    ref_f32 = reference_forward_f32(fix, part_id, class_ids, w1, b1, w2, b2)

    assert out.shape == (batch, embed_dim)
    # Tight check against the matched-precision (bf16-weight) reference.
    assert jnp.allclose(out, ref_bf16, atol=1e-2, rtol=1e-2), "mismatch vs bf16 reference"
    # Loose check against the original full-f32 module math (bf16 weight quantization).
    assert jnp.allclose(out, ref_f32, atol=5e-2, rtol=5e-2), "mismatch vs f32 reference"

    print("KERNEL_OK")
</pallas_src>

<mosaic_0001>
module attributes {stable_mosaic.version = 11 : i64} {
  func.func @soa_kernel(%arg0: i32, %arg1: memref<8xi32, #tpu.memory_space<smem>>, %arg2: memref<8x128xf32, #tpu.memory_space<any>>, %arg3: memref<128x128xbf16, #tpu.memory_space<vmem>>, %arg4: memref<1x128xf32, #tpu.memory_space<vmem>>, %arg5: memref<128x128xbf16, #tpu.memory_space<any>>, %arg6: memref<1x128xf32, #tpu.memory_space<vmem>>, %arg7: memref<8x128xf32, #tpu.memory_space<vmem>>, %arg8: memref<8x128xf32, #tpu.memory_space<vmem>>, %arg9: memref<8x!tpu.dma_semaphore, #tpu.memory_space<semaphore_mem>>, %arg10: memref<128x128xbf16, #tpu.memory_space<vmem>>, %arg11: memref<!tpu.dma_semaphore, #tpu.memory_space<semaphore_mem>>) attributes {dimension_semantics = [#tpu.dimension_semantics<parallel>], iteration_bounds = array<i64: 1>, scalar_prefetch = 1 : i64, scratch_operands = 4 : i64, tpu.core_type = #tpu.core_type<tc>, window_params = [{}, {pipeline_mode = #tpu.pipeline_mode<synchronous>, transform_indices = @transform_1, window_bounds = array<i64: 128, 128>}, {pipeline_mode = #tpu.pipeline_mode<synchronous>, transform_indices = @transform_2, window_bounds = array<i64: 1, 128>}, {}, {pipeline_mode = #tpu.pipeline_mode<synchronous>, transform_indices = @transform_4, window_bounds = array<i64: 1, 128>}, {transform_indices = @transform_5, window_bounds = array<i64: 8, 128>}]} {
    %c8_i32 = arith.constant 8 : i32
    %0 = arith.muli %arg0, %c8_i32 : i32
    tpu.enqueue_dma source(%arg5 : memref<128x128xbf16, #tpu.memory_space<any>>) target(%arg10 : memref<128x128xbf16, #tpu.memory_space<vmem>>) target_semaphore(%arg11 : memref<!tpu.dma_semaphore, #tpu.memory_space<semaphore_mem>>)
    %c0_i32 = arith.constant 0 : i32
    %1 = arith.addi %0, %c0_i32 : i32
    %2 = arith.index_cast %1 : i32 to index
    %3 = memref.load %arg1[%2] : memref<8xi32, #tpu.memory_space<smem>>
    %c0_i32_0 = arith.constant 0 : i32
    %c0_i32_1 = arith.constant 0 : i32
    %4 = tpu.memref_slice %arg2[%3, %c0_i32_1] : memref<8x128xf32, #tpu.memory_space<any>> -> memref<1x128xf32, #tpu.memory_space<any>>
    %c0_i32_2 = arith.constant 0 : i32
    %c0_i32_3 = arith.constant 0 : i32
    %5 = tpu.memref_slice %arg8[%c0_i32_2, %c0_i32_3] : memref<8x128xf32, #tpu.memory_space<vmem>> -> memref<1x128xf32, #tpu.memory_space<vmem>>
    %6 = tpu.memref_slice %arg9[%c0_i32_0] : memref<8x!tpu.dma_semaphore, #tpu.memory_space<semaphore_mem>> -> memref<1x!tpu.dma_semaphore, #tpu.memory_space<semaphore_mem>>
    %7 = tpu.memref_squeeze %6 : memref<1x!tpu.dma_semaphore, #tpu.memory_space<semaphore_mem>> -> memref<!tpu.dma_semaphore, #tpu.memory_space<semaphore_mem>>
    tpu.enqueue_dma source(%4 : memref<1x128xf32, #tpu.memory_space<any>>) target(%5 : memref<1x128xf32, #tpu.memory_space<vmem>>) target_semaphore(%7 : memref<!tpu.dma_semaphore, #tpu.memory_space<semaphore_mem>>)
    %c1_i32 = arith.constant 1 : i32
    %8 = arith.addi %0, %c1_i32 : i32
    %9 = arith.index_cast %8 : i32 to index
    %10 = memref.load %arg1[%9] : memref<8xi32, #tpu.memory_space<smem>>
    %c1_i32_4 = arith.constant 1 : i32
    %c0_i32_5 = arith.constant 0 : i32
    %11 = tpu.memref_slice %arg2[%10, %c0_i32_5] : memref<8x128xf32, #tpu.memory_space<any>> -> memref<1x128xf32, #tpu.memory_space<any>>
    %c1_i32_6 = arith.constant 1 : i32
    %c0_i32_7 = arith.constant 0 : i32
    %12 = tpu.memref_slice %arg8[%c1_i32_6, %c0_i32_7] : memref<8x128xf32, #tpu.memory_space<vmem>> -> memref<1x128xf32, #tpu.memory_space<vmem>>
    %13 = tpu.memref_slice %arg9[%c1_i32_4] : memref<8x!tpu.dma_semaphore, #tpu.memory_space<semaphore_mem>> -> memref<1x!tpu.dma_semaphore, #tpu.memory_space<semaphore_mem>>
    %14 = tpu.memref_squeeze %13 : memref<1x!tpu.dma_semaphore, #tpu.memory_space<semaphore_mem>> -> memref<!tpu.dma_semaphore, #tpu.memory_space<semaphore_mem>>
    tpu.enqueue_dma source(%11 : memref<1x128xf32, #tpu.memory_space<any>>) target(%12 : memref<1x128xf32, #tpu.memory_space<vmem>>) target_semaphore(%14 : memref<!tpu.dma_semaphore, #tpu.memory_space<semaphore_mem>>)
    %c2_i32 = arith.constant 2 : i32
    %15 = arith.addi %0, %c2_i32 : i32
    %16 = arith.index_cast %15 : i32 to index
    %17 = memref.load %arg1[%16] : memref<8xi32, #tpu.memory_space<smem>>
    %c2_i32_8 = arith.constant 2 : i32
    %c0_i32_9 = arith.constant 0 : i32
    %18 = tpu.memref_slice %arg2[%17, %c0_i32_9] : memref<8x128xf32, #tpu.memory_space<any>> -> memref<1x128xf32, #tpu.memory_space<any>>
    %c2_i32_10 = arith.constant 2 : i32
    %c0_i32_11 = arith.constant 0 : i32
    %19 = tpu.memref_slice %arg8[%c2_i32_10, %c0_i32_11] : memref<8x128xf32, #tpu.memory_space<vmem>> -> memref<1x128xf32, #tpu.memory_space<vmem>>
    %20 = tpu.memref_slice %arg9[%c2_i32_8] : memref<8x!tpu.dma_semaphore, #tpu.memory_space<semaphore_mem>> -> memref<1x!tpu.dma_semaphore, #tpu.memory_space<semaphore_mem>>
    %21 = tpu.memref_squeeze %20 : memref<1x!tpu.dma_semaphore, #tpu.memory_space<semaphore_mem>> -> memref<!tpu.dma_semaphore, #tpu.memory_space<semaphore_mem>>
    tpu.enqueue_dma source(%18 : memref<1x128xf32, #tpu.memory_space<any>>) target(%19 : memref<1x128xf32, #tpu.memory_space<vmem>>) target_semaphore(%21 : memref<!tpu.dma_semaphore, #tpu.memory_space<semaphore_mem>>)
    %c3_i32 = arith.constant 3 : i32
    %22 = arith.addi %0, %c3_i32 : i32
    %23 = arith.index_cast %22 : i32 to index
    %24 = memref.load %arg1[%23] : memref<8xi32, #tpu.memory_space<smem>>
    %c3_i32_12 = arith.constant 3 : i32
    %c0_i32_13 = arith.constant 0 : i32
    %25 = tpu.memref_slice %arg2[%24, %c0_i32_13] : memref<8x128xf32, #tpu.memory_space<any>> -> memref<1x128xf32, #tpu.memory_space<any>>
    %c3_i32_14 = arith.constant 3 : i32
    %c0_i32_15 = arith.constant 0 : i32
    %26 = tpu.memref_slice %arg8[%c3_i32_14, %c0_i32_15] : memref<8x128xf32, #tpu.memory_space<vmem>> -> memref<1x128xf32, #tpu.memory_space<vmem>>
    %27 = tpu.memref_slice %arg9[%c3_i32_12] : memref<8x!tpu.dma_semaphore, #tpu.memory_space<semaphore_mem>> -> memref<1x!tpu.dma_semaphore, #tpu.memory_space<semaphore_mem>>
    %28 = tpu.memref_squeeze %27 : memref<1x!tpu.dma_semaphore, #tpu.memory_space<semaphore_mem>> -> memref<!tpu.dma_semaphore, #tpu.memory_space<semaphore_mem>>
    tpu.enqueue_dma source(%25 : memref<1x128xf32, #tpu.memory_space<any>>) target(%26 : memref<1x128xf32, #tpu.memory_space<vmem>>) target_semaphore(%28 : memref<!tpu.dma_semaphore, #tpu.memory_space<semaphore_mem>>)
    %c4_i32 = arith.constant 4 : i32
    %29 = arith.addi %0, %c4_i32 : i32
    %30 = arith.index_cast %29 : i32 to index
    %31 = memref.load %arg1[%30] : memref<8xi32, #tpu.memory_space<smem>>
    %c4_i32_16 = arith.constant 4 : i32
    %c0_i32_17 = arith.constant 0 : i32
    %32 = tpu.memref_slice %arg2[%31, %c0_i32_17] : memref<8x128xf32, #tpu.memory_space<any>> -> memref<1x128xf32, #tpu.memory_space<any>>
    %c4_i32_18 = arith.constant 4 : i32
    %c0_i32_19 = arith.constant 0 : i32
    %33 = tpu.memref_slice %arg8[%c4_i32_18, %c0_i32_19] : memref<8x128xf32, #tpu.memory_space<vmem>> -> memref<1x128xf32, #tpu.memory_space<vmem>>
    %34 = tpu.memref_slice %arg9[%c4_i32_16] : memref<8x!tpu.dma_semaphore, #tpu.memory_space<semaphore_mem>> -> memref<1x!tpu.dma_semaphore, #tpu.memory_space<semaphore_mem>>
    %35 = tpu.memref_squeeze %34 : memref<1x!tpu.dma_semaphore, #tpu.memory_space<semaphore_mem>> -> memref<!tpu.dma_semaphore, #tpu.memory_space<semaphore_mem>>
    tpu.enqueue_dma source(%32 : memref<1x128xf32, #tpu.memory_space<any>>) target(%33 : memref<1x128xf32, #tpu.memory_space<vmem>>) target_semaphore(%35 : memref<!tpu.dma_semaphore, #tpu.memory_space<semaphore_mem>>)
    %c5_i32 = arith.constant 5 : i32
    %36 = arith.addi %0, %c5_i32 : i32
    %37 = arith.index_cast %36 : i32 to index
    %38 = memref.load %arg1[%37] : memref<8xi32, #tpu.memory_space<smem>>
    %c5_i32_20 = arith.constant 5 : i32
    %c0_i32_21 = arith.constant 0 : i32
    %39 = tpu.memref_slice %arg2[%38, %c0_i32_21] : memref<8x128xf32, #tpu.memory_space<any>> -> memref<1x128xf32, #tpu.memory_space<any>>
    %c5_i32_22 = arith.constant 5 : i32
    %c0_i32_23 = arith.constant 0 : i32
    %40 = tpu.memref_slice %arg8[%c5_i32_22, %c0_i32_23] : memref<8x128xf32, #tpu.memory_space<vmem>> -> memref<1x128xf32, #tpu.memory_space<vmem>>
    %41 = tpu.memref_slice %arg9[%c5_i32_20] : memref<8x!tpu.dma_semaphore, #tpu.memory_space<semaphore_mem>> -> memref<1x!tpu.dma_semaphore, #tpu.memory_space<semaphore_mem>>
    %42 = tpu.memref_squeeze %41 : memref<1x!tpu.dma_semaphore, #tpu.memory_space<semaphore_mem>> -> memref<!tpu.dma_semaphore, #tpu.memory_space<semaphore_mem>>
    tpu.enqueue_dma source(%39 : memref<1x128xf32, #tpu.memory_space<any>>) target(%40 : memref<1x128xf32, #tpu.memory_space<vmem>>) target_semaphore(%42 : memref<!tpu.dma_semaphore, #tpu.memory_space<semaphore_mem>>)
    %c6_i32 = arith.constant 6 : i32
    %43 = arith.addi %0, %c6_i32 : i32
    %44 = arith.index_cast %43 : i32 to index
    %45 = memref.load %arg1[%44] : memref<8xi32, #tpu.memory_space<smem>>
    %c6_i32_24 = arith.constant 6 : i32
    %c0_i32_25 = arith.constant 0 : i32
    %46 = tpu.memref_slice %arg2[%45, %c0_i32_25] : memref<8x128xf32, #tpu.memory_space<any>> -> memref<1x128xf32, #tpu.memory_space<any>>
    %c6_i32_26 = arith.constant 6 : i32
    %c0_i32_27 = arith.constant 0 : i32
    %47 = tpu.memref_slice %arg8[%c6_i32_26, %c0_i32_27] : memref<8x128xf32, #tpu.memory_space<vmem>> -> memref<1x128xf32, #tpu.memory_space<vmem>>
    %48 = tpu.memref_slice %arg9[%c6_i32_24] : memref<8x!tpu.dma_semaphore, #tpu.memory_space<semaphore_mem>> -> memref<1x!tpu.dma_semaphore, #tpu.memory_space<semaphore_mem>>
    %49 = tpu.memref_squeeze %48 : memref<1x!tpu.dma_semaphore, #tpu.memory_space<semaphore_mem>> -> memref<!tpu.dma_semaphore, #tpu.memory_space<semaphore_mem>>
    tpu.enqueue_dma source(%46 : memref<1x128xf32, #tpu.memory_space<any>>) target(%47 : memref<1x128xf32, #tpu.memory_space<vmem>>) target_semaphore(%49 : memref<!tpu.dma_semaphore, #tpu.memory_space<semaphore_mem>>)
    %c7_i32 = arith.constant 7 : i32
    %50 = arith.addi %0, %c7_i32 : i32
    %51 = arith.index_cast %50 : i32 to index
    %52 = memref.load %arg1[%51] : memref<8xi32, #tpu.memory_space<smem>>
    %c7_i32_28 = arith.constant 7 : i32
    %c0_i32_29 = arith.constant 0 : i32
    %53 = tpu.memref_slice %arg2[%52, %c0_i32_29] : memref<8x128xf32, #tpu.memory_space<any>> -> memref<1x128xf32, #tpu.memory_space<any>>
    %c7_i32_30 = arith.constant 7 : i32
    %c0_i32_31 = arith.constant 0 : i32
    %54 = tpu.memref_slice %arg8[%c7_i32_30, %c0_i32_31] : memref<8x128xf32, #tpu.memory_space<vmem>> -> memref<1x128xf32, #tpu.memory_space<vmem>>
    %55 = tpu.memref_slice %arg9[%c7_i32_28] : memref<8x!tpu.dma_semaphore, #tpu.memory_space<semaphore_mem>> -> memref<1x!tpu.dma_semaphore, #tpu.memory_space<semaphore_mem>>
    %56 = tpu.memref_squeeze %55 : memref<1x!tpu.dma_semaphore, #tpu.memory_space<semaphore_mem>> -> memref<!tpu.dma_semaphore, #tpu.memory_space<semaphore_mem>>
    tpu.enqueue_dma source(%53 : memref<1x128xf32, #tpu.memory_space<any>>) target(%54 : memref<1x128xf32, #tpu.memory_space<vmem>>) target_semaphore(%56 : memref<!tpu.dma_semaphore, #tpu.memory_space<semaphore_mem>>)
    %c0_i32_32 = arith.constant 0 : i32
    %c0_i32_33 = arith.constant 0 : i32
    %c0_i32_34 = arith.constant 0 : i32
    %57 = tpu.memref_slice %arg2[%c0_i32_33, %c0_i32_34] : memref<8x128xf32, #tpu.memory_space<any>> -> memref<1x128xf32, #tpu.memory_space<any>>
    %c0_i32_35 = arith.constant 0 : i32
    %c0_i32_36 = arith.constant 0 : i32
    %58 = tpu.memref_slice %arg8[%c0_i32_35, %c0_i32_36] : memref<8x128xf32, #tpu.memory_space<vmem>> -> memref<1x128xf32, #tpu.memory_space<vmem>>
    %59 = tpu.memref_slice %arg9[%c0_i32_32] : memref<8x!tpu.dma_semaphore, #tpu.memory_space<semaphore_mem>> -> memref<1x!tpu.dma_semaphore, #tpu.memory_space<semaphore_mem>>
    %60 = tpu.memref_squeeze %59 : memref<1x!tpu.dma_semaphore, #tpu.memory_space<semaphore_mem>> -> memref<!tpu.dma_semaphore, #tpu.memory_space<semaphore_mem>>
    tpu.wait_dma2 semaphore(%60 : memref<!tpu.dma_semaphore, #tpu.memory_space<semaphore_mem>>) src(%57 : memref<1x128xf32, #tpu.memory_space<any>>) dst(%58 : memref<1x128xf32, #tpu.memory_space<vmem>>)
    %c1_i32_37 = arith.constant 1 : i32
    %c0_i32_38 = arith.constant 0 : i32
    %c0_i32_39 = arith.constant 0 : i32
    %61 = tpu.memref_slice %arg2[%c0_i32_38, %c0_i32_39] : memref<8x128xf32, #tpu.memory_space<any>> -> memref<1x128xf32, #tpu.memory_space<any>>
    %c1_i32_40 = arith.constant 1 : i32
    %c0_i32_41 = arith.constant 0 : i32
    %62 = tpu.memref_slice %arg8[%c1_i32_40, %c0_i32_41] : memref<8x128xf32, #tpu.memory_space<vmem>> -> memref<1x128xf32, #tpu.memory_space<vmem>>
    %63 = tpu.memref_slice %arg9[%c1_i32_37] : memref<8x!tpu.dma_semaphore, #tpu.memory_space<semaphore_mem>> -> memref<1x!tpu.dma_semaphore, #tpu.memory_space<semaphore_mem>>
    %64 = tpu.memref_squeeze %63 : memref<1x!tpu.dma_semaphore, #tpu.memory_space<semaphore_mem>> -> memref<!tpu.dma_semaphore, #tpu.memory_space<semaphore_mem>>
    tpu.wait_dma2 semaphore(%64 : memref<!tpu.dma_semaphore, #tpu.memory_space<semaphore_mem>>) src(%61 : memref<1x128xf32, #tpu.memory_space<any>>) dst(%62 : memref<1x128xf32, #tpu.memory_space<vmem>>)
    %c2_i32_42 = arith.constant 2 : i32
    %c0_i32_43 = arith.constant 0 : i32
    %c0_i32_44 = arith.constant 0 : i32
    %65 = tpu.memref_slice %arg2[%c0_i32_43, %c0_i32_44] : memref<8x128xf32, #tpu.memory_space<any>> -> memref<1x128xf32, #tpu.memory_space<any>>
    %c2_i32_45 = arith.constant 2 : i32
    %c0_i32_46 = arith.constant 0 : i32
    %66 = tpu.memref_slice %arg8[%c2_i32_45, %c0_i32_46] : memref<8x128xf32, #tpu.memory_space<vmem>> -> memref<1x128xf32, #tpu.memory_space<vmem>>
    %67 = tpu.memref_slice %arg9[%c2_i32_42] : memref<8x!tpu.dma_semaphore, #tpu.memory_space<semaphore_mem>> -> memref<1x!tpu.dma_semaphore, #tpu.memory_space<semaphore_mem>>
    %68 = tpu.memref_squeeze %67 : memref<1x!tpu.dma_semaphore, #tpu.memory_space<semaphore_mem>> -> memref<!tpu.dma_semaphore, #tpu.memory_space<semaphore_mem>>
    tpu.wait_dma2 semaphore(%68 : memref<!tpu.dma_semaphore, #tpu.memory_space<semaphore_mem>>) src(%65 : memref<1x128xf32, #tpu.memory_space<any>>) dst(%66 : memref<1x128xf32, #tpu.memory_space<vmem>>)
    %c3_i32_47 = arith.constant 3 : i32
    %c0_i32_48 = arith.constant 0 : i32
    %c0_i32_49 = arith.constant 0 : i32
    %69 = tpu.memref_slice %arg2[%c0_i32_48, %c0_i32_49] : memref<8x128xf32, #tpu.memory_space<any>> -> memref<1x128xf32, #tpu.memory_space<any>>
    %c3_i32_50 = arith.constant 3 : i32
    %c0_i32_51 = arith.constant 0 : i32
    %70 = tpu.memref_slice %arg8[%c3_i32_50, %c0_i32_51] : memref<8x128xf32, #tpu.memory_space<vmem>> -> memref<1x128xf32, #tpu.memory_space<vmem>>
    %71 = tpu.memref_slice %arg9[%c3_i32_47] : memref<8x!tpu.dma_semaphore, #tpu.memory_space<semaphore_mem>> -> memref<1x!tpu.dma_semaphore, #tpu.memory_space<semaphore_mem>>
    %72 = tpu.memref_squeeze %71 : memref<1x!tpu.dma_semaphore, #tpu.memory_space<semaphore_mem>> -> memref<!tpu.dma_semaphore, #tpu.memory_space<semaphore_mem>>
    tpu.wait_dma2 semaphore(%72 : memref<!tpu.dma_semaphore, #tpu.memory_space<semaphore_mem>>) src(%69 : memref<1x128xf32, #tpu.memory_space<any>>) dst(%70 : memref<1x128xf32, #tpu.memory_space<vmem>>)
    %c4_i32_52 = arith.constant 4 : i32
    %c0_i32_53 = arith.constant 0 : i32
    %c0_i32_54 = arith.constant 0 : i32
    %73 = tpu.memref_slice %arg2[%c0_i32_53, %c0_i32_54] : memref<8x128xf32, #tpu.memory_space<any>> -> memref<1x128xf32, #tpu.memory_space<any>>
    %c4_i32_55 = arith.constant 4 : i32
    %c0_i32_56 = arith.constant 0 : i32
    %74 = tpu.memref_slice %arg8[%c4_i32_55, %c0_i32_56] : memref<8x128xf32, #tpu.memory_space<vmem>> -> memref<1x128xf32, #tpu.memory_space<vmem>>
    %75 = tpu.memref_slice %arg9[%c4_i32_52] : memref<8x!tpu.dma_semaphore, #tpu.memory_space<semaphore_mem>> -> memref<1x!tpu.dma_semaphore, #tpu.memory_space<semaphore_mem>>
    %76 = tpu.memref_squeeze %75 : memref<1x!tpu.dma_semaphore, #tpu.memory_space<semaphore_mem>> -> memref<!tpu.dma_semaphore, #tpu.memory_space<semaphore_mem>>
    tpu.wait_dma2 semaphore(%76 : memref<!tpu.dma_semaphore, #tpu.memory_space<semaphore_mem>>) src(%73 : memref<1x128xf32, #tpu.memory_space<any>>) dst(%74 : memref<1x128xf32, #tpu.memory_space<vmem>>)
    %c5_i32_57 = arith.constant 5 : i32
    %c0_i32_58 = arith.constant 0 : i32
    %c0_i32_59 = arith.constant 0 : i32
    %77 = tpu.memref_slice %arg2[%c0_i32_58, %c0_i32_59] : memref<8x128xf32, #tpu.memory_space<any>> -> memref<1x128xf32, #tpu.memory_space<any>>
    %c5_i32_60 = arith.constant 5 : i32
    %c0_i32_61 = arith.constant 0 : i32
    %78 = tpu.memref_slice %arg8[%c5_i32_60, %c0_i32_61] : memref<8x128xf32, #tpu.memory_space<vmem>> -> memref<1x128xf32, #tpu.memory_space<vmem>>
    %79 = tpu.memref_slice %arg9[%c5_i32_57] : memref<8x!tpu.dma_semaphore, #tpu.memory_space<semaphore_mem>> -> memref<1x!tpu.dma_semaphore, #tpu.memory_space<semaphore_mem>>
    %80 = tpu.memref_squeeze %79 : memref<1x!tpu.dma_semaphore, #tpu.memory_space<semaphore_mem>> -> memref<!tpu.dma_semaphore, #tpu.memory_space<semaphore_mem>>
    tpu.wait_dma2 semaphore(%80 : memref<!tpu.dma_semaphore, #tpu.memory_space<semaphore_mem>>) src(%77 : memref<1x128xf32, #tpu.memory_space<any>>) dst(%78 : memref<1x128xf32, #tpu.memory_space<vmem>>)
    %c6_i32_62 = arith.constant 6 : i32
    %c0_i32_63 = arith.constant 0 : i32
    %c0_i32_64 = arith.constant 0 : i32
    %81 = tpu.memref_slice %arg2[%c0_i32_63, %c0_i32_64] : memref<8x128xf32, #tpu.memory_space<any>> -> memref<1x128xf32, #tpu.memory_space<any>>
    %c6_i32_65 = arith.constant 6 : i32
    %c0_i32_66 = arith.constant 0 : i32
    %82 = tpu.memref_slice %arg8[%c6_i32_65, %c0_i32_66] : memref<8x128xf32, #tpu.memory_space<vmem>> -> memref<1x128xf32, #tpu.memory_space<vmem>>
    %83 = tpu.memref_slice %arg9[%c6_i32_62] : memref<8x!tpu.dma_semaphore, #tpu.memory_space<semaphore_mem>> -> memref<1x!tpu.dma_semaphore, #tpu.memory_space<semaphore_mem>>
    %84 = tpu.memref_squeeze %83 : memref<1x!tpu.dma_semaphore, #tpu.memory_space<semaphore_mem>> -> memref<!tpu.dma_semaphore, #tpu.memory_space<semaphore_mem>>
    tpu.wait_dma2 semaphore(%84 : memref<!tpu.dma_semaphore, #tpu.memory_space<semaphore_mem>>) src(%81 : memref<1x128xf32, #tpu.memory_space<any>>) dst(%82 : memref<1x128xf32, #tpu.memory_space<vmem>>)
    %c7_i32_67 = arith.constant 7 : i32
    %c0_i32_68 = arith.constant 0 : i32
    %c0_i32_69 = arith.constant 0 : i32
    %85 = tpu.memref_slice %arg2[%c0_i32_68, %c0_i32_69] : memref<8x128xf32, #tpu.memory_space<any>> -> memref<1x128xf32, #tpu.memory_space<any>>
    %c7_i32_70 = arith.constant 7 : i32
    %c0_i32_71 = arith.constant 0 : i32
    %86 = tpu.memref_slice %arg8[%c7_i32_70, %c0_i32_71] : memref<8x128xf32, #tpu.memory_space<vmem>> -> memref<1x128xf32, #tpu.memory_space<vmem>>
    %87 = tpu.memref_slice %arg9[%c7_i32_67] : memref<8x!tpu.dma_semaphore, #tpu.memory_space<semaphore_mem>> -> memref<1x!tpu.dma_semaphore, #tpu.memory_space<semaphore_mem>>
    %88 = tpu.memref_squeeze %87 : memref<1x!tpu.dma_semaphore, #tpu.memory_space<semaphore_mem>> -> memref<!tpu.dma_semaphore, #tpu.memory_space<semaphore_mem>>
    tpu.wait_dma2 semaphore(%88 : memref<!tpu.dma_semaphore, #tpu.memory_space<semaphore_mem>>) src(%85 : memref<1x128xf32, #tpu.memory_space<any>>) dst(%86 : memref<1x128xf32, #tpu.memory_space<vmem>>)
    %c0 = arith.constant 0 : index
    %c0_72 = arith.constant 0 : index
    %89 = vector.load %arg8[%c0, %c0_72] : memref<8x128xf32, #tpu.memory_space<vmem>>, vector<8x128xf32>
    %90 = arith.truncf %89 : vector<8x128xf32> to vector<8x128xbf16>
    %c0_73 = arith.constant 0 : index
    %c0_74 = arith.constant 0 : index
    %91 = vector.load %arg3[%c0_73, %c0_74] : memref<128x128xbf16, #tpu.memory_space<vmem>>, vector<128x128xbf16>
    %cst = arith.constant dense<0.000000e+00> : vector<8x128xf32>
    %92 = tpu.matmul %90, %91, %cst {dimension_numbers = #tpu.dot_dimension_numbers<[1], [0], [0], [1], [0, 0, 1, 1], [], []>} : vector<8x128xbf16>, vector<128x128xbf16>, vector<8x128xf32> -> vector<8x128xf32>
    %c0_75 = arith.constant 0 : index
    %c0_76 = arith.constant 0 : index
    %93 = vector.load %arg4[%c0_75, %c0_76] : memref<1x128xf32, #tpu.memory_space<vmem>>, vector<1x128xf32>
    %94 = vector.broadcast %93 : vector<1x128xf32> to vector<8x128xf32>
    %95 = arith.addf %92, %94 : vector<8x128xf32>
    %cst_77 = arith.constant 0.000000e+00 : f32
    %96 = vector.broadcast %cst_77 : f32 to vector<8x128xf32>
    %97 = arith.maximumf %95, %96 : vector<8x128xf32>
    tpu.wait_dma2 semaphore(%arg11 : memref<!tpu.dma_semaphore, #tpu.memory_space<semaphore_mem>>) src(%arg5 : memref<128x128xbf16, #tpu.memory_space<any>>) dst(%arg10 : memref<128x128xbf16, #tpu.memory_space<vmem>>)
    %98 = arith.truncf %97 : vector<8x128xf32> to vector<8x128xbf16>
    %c0_78 = arith.constant 0 : index
    %c0_79 = arith.constant 0 : index
    %99 = vector.load %arg10[%c0_78, %c0_79] : memref<128x128xbf16, #tpu.memory_space<vmem>>, vector<128x128xbf16>
    %cst_80 = arith.constant dense<0.000000e+00> : vector<8x128xf32>
    %100 = tpu.matmul %98, %99, %cst_80 {dimension_numbers = #tpu.dot_dimension_numbers<[1], [0], [0], [1], [0, 0, 1, 1], [], []>} : vector<8x128xbf16>, vector<128x128xbf16>, vector<8x128xf32> -> vector<8x128xf32>
    %c0_81 = arith.constant 0 : index
    %c0_82 = arith.constant 0 : index
    %101 = vector.load %arg6[%c0_81, %c0_82] : memref<1x128xf32, #tpu.memory_space<vmem>>, vector<1x128xf32>
    %102 = vector.broadcast %101 : vector<1x128xf32> to vector<8x128xf32>
    %103 = arith.addf %100, %102 : vector<8x128xf32>
    %104 = arith.addf %89, %103 : vector<8x128xf32>
    %c0_83 = arith.constant 0 : index
    %c0_84 = arith.constant 0 : index
    %105 = vector.load %arg7[%c0_83, %c0_84] : memref<8x128xf32, #tpu.memory_space<vmem>>, vector<8x128xf32>
    tpu.vector_store %arg7[%c0_83, %c0_84], %104 {strides = array<i32>} : memref<8x128xf32, #tpu.memory_space<vmem>>, vector<8x128xf32>,
    return
  }
  func.func @transform_1(%arg0: i32, %arg1: memref<8xi32, #tpu.memory_space<smem>>) -> (i32, i32) {
    %c0_i32 = arith.constant 0 : i32
    %c0_i32_0 = arith.constant 0 : i32
    %c0_i32_1 = arith.constant 0 : i32
    return %c0_i32, %c0_i32_0 : i32, i32
  }
  func.func @transform_2(%arg0: i32, %arg1: memref<8xi32, #tpu.memory_space<smem>>) -> (i32, i32) {
    %c0_i32 = arith.constant 0 : i32
    %c0_i32_0 = arith.constant 0 : i32
    %c0_i32_1 = arith.constant 0 : i32
    return %c0_i32, %c0_i32_0 : i32, i32
  }
  func.func @transform_4(%arg0: i32, %arg1: memref<8xi32, #tpu.memory_space<smem>>) -> (i32, i32) {
    %c0_i32 = arith.constant 0 : i32
    %c0_i32_0 = arith.constant 0 : i32
    %c0_i32_1 = arith.constant 0 : i32
    return %c0_i32, %c0_i32_0 : i32, i32
  }
  func.func @transform_5(%arg0: i32, %arg1: memref<8xi32, #tpu.memory_space<smem>>) -> (i32, i32) {
    %c0_i32 = arith.constant 0 : i32
    %c0_i32_0 = arith.constant 0 : i32
    return %arg0, %c0_i32 : i32, i32
  }
}

</mosaic_0001>

<bundles_post_ra>
// kernel: tpu_custom_call.1
= control target key start
LH: loop header
LB: loop body
LE: loop exit
PB: predicated region body
PF: predicated region fallthrough
CT: control target
= control target key end

     0   :  { %s1110_s0 = inlined_call_operand.hbm [shape: s32[8], index: 0, kind: input, shape index: {}]   ;;  %s1111_s1 = inlined_call_operand.hbm [shape: f32[8,128], index: 1, kind: input, shape index: {}]   ;;  %s1112_s2 = inlined_call_operand.hbm [shape: bf16[128,128], index: 2, kind: input, shape index: {}]   ;;  %s1113_s3 = inlined_call_operand.vmem [shape: f32[1,128], index: 3, kind: input, shape index: {}]   ;;  %s1114_s4 = inlined_call_operand.hbm [shape: bf16[128,128], index: 4, kind: input, shape index: {}]   ;;  %s1115_s5 = inlined_call_operand.vmem [shape: f32[1,128], index: 5, kind: input, shape index: {}]   ;;  %s1116_s6 = inlined_call_operand.hbm [shape: f32[8,128], index: 6, kind: output, shape index: {}]  }
   0x1   :  { %s583_s23 = scalar_lea.hbm %s1110_s0, 16 }
   0x2   :  { %p584_p0 = scmp.ne.s32.totalorder %s1110_s0, %s583_s23  ;;  %p587_p1 = scmp.lt.u32.totalorder %s583_s23, %s1110_s0 }
   0x4   :  { %p589_p2 = pnand %p587_p1, %p584_p0 }
   0x6   :  { %592 = shalt.err (!%p589_p2)  }
   0x7   :  { %s875_s28 = smov [#allocation7]  }
   0x8   :  { %12 = dma.hbm_to_smem %s1110_s0, 16, %s875_s28, [#allocation6] }
   0x9   :  { %851 = dma.done.wait [#allocation6], 16 }
   0xa   :  { %852 = vsyncadd [#allocation6], 4294967280 }
   0xb   :  { %14 = sfence }
   0xc   :  { %15 = vsyncpa [#allocation9], 0 }
   0xd   :  { %16 = vsyncpa [#allocation10], 0  ;;  %s876_s7 = smov [#allocation8]   ;;  %s593_s11 = scalar_lea.hbm %s1112_s2, 1024 }
   0xe   :  { %s22_s8 = sshll.u32 %s876_s7, 4  ;;  %p594_p3 = scmp.ne.s32.totalorder %s1112_s2, %s593_s11  ;;  %s23_s8 = int_to_ptr.vmem [resolvable:$true] %s22_s8 }
   0xf   :  { %p597_p4 = scmp.lt.u32.totalorder %s593_s11, %s1112_s2 }
  0x11   :  { %p599_p5 = pnand %p597_p4, %p594_p3 }
  0x13   :  { %602 = shalt.err (!%p599_p5)
}
  0x14   :  { %s603_s0 = scalar_lea.vmem %s23_s8, 1024  ;;  %p608_p7 = scmp.lt.s32.totalorder %s23_s8, %s23_s8 }
  0x15   :  { %p604_p6 = scmp.ne.s32.totalorder %s23_s8, %s603_s0  ;;  %p609_p8 = scmp.lt.s32.totalorder %s603_s0, %s603_s0 }
  0x17   :  { %p610_p9 = por %p609_p8, %p608_p7 }
  0x19   :  { %p611_p10 = pnand %p610_p9, %p604_p6 }
  0x1b   :  { %614 = shalt.err (!%p611_p10)
}
  0x1c   :  { %s877_s16 = smov 64   ;;  %s878_s17 = smov 4  }
  0x1d   :  { %28 = dma.hbm_to_vmem [thread:$0]  %s1112_s2, 1024, %s23_s8, [#allocation9], %s877_s16, %s877_s16, %s878_s17  }
  0x1e   :  { %853 = dma.done.wait [#allocation9], 1024  }
  0x1f   :  { %854 = vsyncadd [#allocation9], 4294966272  ;;  %s49_s20 = sld [smem:[#allocation7]]  ;;  %s879_s21 = smov [#allocation2]  }
  0x20   :  { %s59_s22 = sshll.u32 %s879_s21, 4  ;;  %s952_s23 = sld [smem:[#allocation7 + $0x1]]  ;;  %s950_s22 = int_to_ptr.vmem [resolvable:$true] %s59_s22 }
  0x21   :  { %s880_s24 = smov [#allocation2 + $0x1]   ;;  %s954_s26 = sld [smem:[#allocation7 + $0x2]] }
  0x22   :  { %s76_s25 = sshll.u32 %s880_s24, 4  ;;  %s881_s27 = smov [#allocation2 + $0x2]   ;;  %s956_s25 = int_to_ptr.vmem [resolvable:$true] %s76_s25 }
  0x23   :  { %s93_s28 = sshll.u32 %s881_s27, 4  ;;  %s958_s29 = sld [smem:[#allocation7 + $0x3]]  ;;  %s960_s28 = int_to_ptr.vmem [resolvable:$true] %s93_s28 }
  0x24   :  { %s882_s30 = smov [#allocation2 + $0x3]   ;;  %s971_s15 = scalar_lea.hbm %s1111_s1, 128 }
  0x25   :  { %s467_s2 = sshll.u32 %s49_s20, 4  ;;  %s962_s7 = sshll.u32 %s882_s30, 4  ;;  %s111_s7 = int_to_ptr.vmem [resolvable:$true] %s962_s7 }
  0x26   :  { %s51_s10 = scalar_lea.hbm %s1111_s1, %s467_s2  ;;  %s469_s11 = sshll.u32 %s952_s23, 4 }
  0x27   :  { %s615_s12 = scalar_lea.hbm %s51_s10, 16  ;;  %p618_p12 = scmp.lt.u32.totalorder %s51_s10, %s1111_s1 }
  0x28   :  { %p616_p11 = scmp.ne.s32.totalorder %s51_s10, %s615_s12  ;;  %p619_p13 = scmp.lt.u32.totalorder %s971_s15, %s615_s12 }
  0x29   :  { %p621_p1 = scmp.lt.u32.totalorder %s615_s12, %s51_s10 }
  0x2a   :  { %p620_p0 = por %p619_p13, %p618_p12 }
  0x2c   :  { %p622_p2 = por %p621_p1, %p620_p0 }
  0x2e   :  { %p623_p3 = pnand %p622_p2, %p616_p11 }
  0x30   :  { %626 = shalt.err (!%p623_p3)  }
  0x31   :  { %s627_s17 = scalar_lea.vmem %s950_s22, 16  ;;  %s980_s18 = scalar_lea.vmem %s950_s22, 128 }
  0x32   :  { %p628_p4 = scmp.ne.s32.totalorder %s950_s22, %s627_s17  ;;  %p632_p5 = scmp.lt.s32.totalorder %s950_s22, %s950_s22 }
  0x33   :  { %p633_p6 = scmp.lt.s32.totalorder %s980_s18, %s627_s17 }
  0x35   :  { %p634_p7 = por %p633_p6, %p632_p5 }
  0x37   :  { %p635_p8 = pnand %p634_p7, %p628_p4 }
  0x39   :  { %638 = shalt.err (!%p635_p8)  }
  0x3a   :  { %62 = dma.hbm_to_vmem [thread:$0]  %s51_s10, 16, %s950_s22, [#allocation3] }
  0x3b   :  { %s66_s21 = scalar_lea.hbm %s1111_s1, %s469_s11  ;;  %s471_s23 = sshll.u32 %s954_s26, 4 }
  0x3c   :  { %s639_s24 = scalar_lea.hbm %s66_s21, 16  ;;  %p642_p10 = scmp.lt.u32.totalorder %s66_s21, %s1111_s1 }
  0x3d   :  { %p640_p9 = scmp.ne.s32.totalorder %s66_s21, %s639_s24  ;;  %p643_p11 = scmp.lt.u32.totalorder %s971_s15, %s639_s24 }
  0x3e   :  { %p645_p13 = scmp.lt.u32.totalorder %s639_s24, %s66_s21 }
  0x3f   :  { %p644_p12 = por %p643_p11, %p642_p10 }
  0x41   :  { %p646_p0 = por %p645_p13, %p644_p12 }
  0x43   :  { %p647_p1 = pnand %p646_p0, %p640_p9 }
  0x45   :  { %650 = shalt.err (!%p647_p1)  }
  0x46   :  { %s651_s30 = scalar_lea.vmem %s956_s25, 16  ;;  %p656_p3 = scmp.lt.s32.totalorder %s956_s25, %s950_s22 }
  0x47   :  { %p652_p2 = scmp.ne.s32.totalorder %s956_s25, %s651_s30  ;;  %p657_p4 = scmp.lt.s32.totalorder %s980_s18, %s651_s30 }
  0x49   :  { %p658_p5 = por %p657_p4, %p656_p3 }
  0x4b   :  { %p659_p6 = pnand %p658_p5, %p652_p2 }
  0x4d   :  { %662 = shalt.err (!%p659_p6)  }
  0x4e   :  { %79 = dma.hbm_to_vmem [thread:$0]  %s66_s21, 16, %s956_s25, [#allocation3 + $0x1] }
  0x4f   :  { %s83_s9 = scalar_lea.hbm %s1111_s1, %s471_s23  ;;  %s473_s10 = sshll.u32 %s958_s29, 4 }
  0x50   :  { %s663_s11 = scalar_lea.hbm %s83_s9, 16  ;;  %p666_p8 = scmp.lt.u32.totalorder %s83_s9, %s1111_s1 }
  0x51   :  { %p664_p7 = scmp.ne.s32.totalorder %s83_s9, %s663_s11  ;;  %p667_p9 = scmp.lt.u32.totalorder %s971_s15, %s663_s11 }
  0x52   :  { %p669_p11 = scmp.lt.u32.totalorder %s663_s11, %s83_s9 }
  0x53   :  { %p668_p10 = por %p667_p9, %p666_p8 }
  0x55   :  { %p670_p12 = por %p669_p11, %p668_p10 }
  0x57   :  { %p671_p13 = pnand %p670_p12, %p664_p7 }
  0x59   :  { %674 = shalt.err (!%p671_p13)  }
  0x5a   :  { %s675_s25 = scalar_lea.vmem %s960_s28, 16  ;;  %p680_p1 = scmp.lt.s32.totalorder %s960_s28, %s950_s22 }
  0x5b   :  { %p676_p0 = scmp.ne.s32.totalorder %s960_s28, %s675_s25  ;;  %p681_p2 = scmp.lt.s32.totalorder %s980_s18, %s675_s25 }
  0x5d   :  { %p682_p3 = por %p681_p2, %p680_p1 }
  0x5f   :  { %p683_p4 = pnand %p682_p3, %p676_p0 }
  0x61   :  { %686 = shalt.err (!%p683_p4)  }
  0x62   :  { %96 = dma.hbm_to_vmem [thread:$0]  %s83_s9, 16, %s960_s28, [#allocation3 + $0x2] }
  0x63   :  { %s100_s0 = scalar_lea.hbm %s1111_s1, %s473_s10 }
  0x64   :  { %s687_s16 = scalar_lea.hbm %s100_s0, 16  ;;  %p690_p6 = scmp.lt.u32.totalorder %s100_s0, %s1111_s1 }
  0x65   :  { %p688_p5 = scmp.ne.s32.totalorder %s100_s0, %s687_s16  ;;  %p691_p7 = scmp.lt.u32.totalorder %s971_s15, %s687_s16 }
  0x66   :  { %p693_p9 = scmp.lt.u32.totalorder %s687_s16, %s100_s0 }
  0x67   :  { %p692_p8 = por %p691_p7, %p690_p6 }
  0x69   :  { %p694_p10 = por %p693_p9, %p692_p8 }
  0x6b   :  { %p695_p11 = pnand %p694_p10, %p688_p5 }
  0x6d   :  { %698 = shalt.err (!%p695_p11)  }
  0x6e   :  { %s699_s20 = scalar_lea.vmem %s111_s7, 16  ;;  %p704_p13 = scmp.lt.s32.totalorder %s111_s7, %s950_s22 }
  0x6f   :  { %p700_p12 = scmp.ne.s32.totalorder %s111_s7, %s699_s20  ;;  %p705_p0 = scmp.lt.s32.totalorder %s980_s18, %s699_s20 }
  0x71   :  { %p706_p1 = por %p705_p0, %p704_p13 }
  0x73   :  { %p707_p2 = pnand %p706_p1, %p700_p12 }
  0x75   :  { %710 = shalt.err (!%p707_p2)  }
  0x76   :  { %113 = dma.hbm_to_vmem [thread:$0]  %s100_s0, 16, %s111_s7, [#allocation3 + $0x3] }
  0x77   :  { %s474_s28 = sld [smem:[#allocation7 + $0x4]]  ;;  %s883_s21 = smov [#allocation2 + $0x4]  }
  0x78   :  { %s127_s23 = sshll.u32 %s883_s21, 4  ;;  %s1024_s24 = sld [smem:[#allocation7 + $0x5]]  ;;  %s128_s23 = int_to_ptr.vmem [resolvable:$true] %s127_s23 }
  0x79   :  { %s884_s27 = smov [#allocation2 + $0x5]   ;;  %s1026_s30 = sld [smem:[#allocation7 + $0x6]] }
  0x7a   :  { %s144_s2 = sshll.u32 %s884_s27, 4  ;;  %s885_s26 = smov [#allocation2 + $0x6]   ;;  %s1028_s2 = int_to_ptr.vmem [resolvable:$true] %s144_s2 }
  0x7b   :  { %s161_s8 = sshll.u32 %s885_s26, 4  ;;  %s1030_s8 = int_to_ptr.vmem [resolvable:$true] %s161_s8 }
  0x7d   :  { %s475_s9 = sshll.u32 %s474_s28, 4 }
  0x7e   :  { %s117_s11 = scalar_lea.hbm %s1111_s1, %s475_s9  ;;  %s477_s12 = sshll.u32 %s1024_s24, 4 }
  0x7f   :  { %s711_s13 = scalar_lea.hbm %s117_s11, 16  ;;  %p714_p4 = scmp.lt.u32.totalorder %s117_s11, %s1111_s1 }
  0x80   :  { %p712_p3 = scmp.ne.s32.totalorder %s117_s11, %s711_s13  ;;  %p715_p5 = scmp.lt.u32.totalorder %s971_s15, %s711_s13 }
  0x81   :  { %p717_p7 = scmp.lt.u32.totalorder %s711_s13, %s117_s11 }
  0x82   :  { %p716_p6 = por %p715_p5, %p714_p4 }
  0x84   :  { %p718_p8 = por %p717_p7, %p716_p6 }
  0x86   :  { %p719_p9 = pnand %p718_p8, %p712_p3 }
  0x88   :  { %722 = shalt.err (!%p719_p9)  }
  0x89   :  { %s723_s14 = scalar_lea.vmem %s128_s23, 16  ;;  %p728_p11 = scmp.lt.s32.totalorder %s128_s23, %s950_s22 }
  0x8a   :  { %p724_p10 = scmp.ne.s32.totalorder %s128_s23, %s723_s14  ;;  %p729_p12 = scmp.lt.s32.totalorder %s980_s18, %s723_s14 }
  0x8c   :  { %p730_p13 = por %p729_p12, %p728_p11 }
  0x8e   :  { %p731_p0 = pnand %p730_p13, %p724_p10 }
  0x90   :  { %734 = shalt.err (!%p731_p0)  }
  0x91   :  { %130 = dma.hbm_to_vmem [thread:$0]  %s117_s11, 16, %s128_s23, [#allocation3 + $0x4] }
  0x92   :  { %s134_s17 = scalar_lea.hbm %s1111_s1, %s477_s12  ;;  %s479_s19 = sshll.u32 %s1026_s30, 4 }
  0x93   :  { %s735_s20 = scalar_lea.hbm %s134_s17, 16  ;;  %p738_p2 = scmp.lt.u32.totalorder %s134_s17, %s1111_s1 }
  0x94   :  { %p736_p1 = scmp.ne.s32.totalorder %s134_s17, %s735_s20  ;;  %p739_p3 = scmp.lt.u32.totalorder %s971_s15, %s735_s20 }
  0x95   :  { %p741_p5 = scmp.lt.u32.totalorder %s735_s20, %s134_s17 }
  0x96   :  { %p740_p4 = por %p739_p3, %p738_p2 }
  0x98   :  { %p742_p6 = por %p741_p5, %p740_p4 }
  0x9a   :  { %p743_p7 = pnand %p742_p6, %p736_p1 }
  0x9c   :  { %746 = shalt.err (!%p743_p7)  }
  0x9d   :  { %s747_s23 = scalar_lea.vmem %s1028_s2, 16  ;;  %p752_p9 = scmp.lt.s32.totalorder %s1028_s2, %s950_s22 }
  0x9e   :  { %p748_p8 = scmp.ne.s32.totalorder %s1028_s2, %s747_s23  ;;  %p753_p10 = scmp.lt.s32.totalorder %s980_s18, %s747_s23 }
  0xa0   :  { %p754_p11 = por %p753_p10, %p752_p9 }
  0xa2   :  { %p755_p12 = pnand %p754_p11, %p748_p8 }
  0xa4   :  { %758 = shalt.err (!%p755_p12)  }
  0xa5   :  { %147 = dma.hbm_to_vmem [thread:$0]  %s134_s17, 16, %s1028_s2, [#allocation3 + $0x5] }
  0xa6   :  { %s151_s30 = scalar_lea.hbm %s1111_s1, %s479_s19  ;;  %s886_s26 = smov [#allocation4]  }
  0xa7   :  { %s45_s9 = sshll.u32 %s886_s26, 4  ;;  %s759_s7 = scalar_lea.hbm %s151_s30, 16  ;;  %s46_s9 = int_to_ptr.vmem [resolvable:$true] %s45_s9 }
  0xa8   :  { %p760_p13 = scmp.ne.s32.totalorder %s151_s30, %s759_s7  ;;  %p762_p0 = scmp.lt.u32.totalorder %s151_s30, %s1111_s1 }
  0xa9   :  { %p763_p1 = scmp.lt.u32.totalorder %s971_s15, %s759_s7  ;;  %p765_p3 = scmp.lt.u32.totalorder %s759_s7, %s151_s30 }
  0xab   :  { %p764_p2 = por %p763_p1, %p762_p0 }
  0xad   :  { %p766_p4 = por %p765_p3, %p764_p2 }
  0xaf   :  { %p767_p5 = pnand %p766_p4, %p760_p13 }
  0xb1   :  { %770 = shalt.err (!%p767_p5)  }
  0xb2   :  { %s771_s2 = scalar_lea.vmem %s1030_s8, 16  ;;  %p776_p7 = scmp.lt.s32.totalorder %s1030_s8, %s950_s22 }
  0xb3   :  { %p772_p6 = scmp.ne.s32.totalorder %s1030_s8, %s771_s2  ;;  %p777_p8 = scmp.lt.s32.totalorder %s980_s18, %s771_s2 }
  0xb5   :  { %p778_p9 = por %p777_p8, %p776_p7 }
  0xb7   :  { %p779_p10 = pnand %p778_p9, %p772_p6 }
  0xb9   :  { %782 = shalt.err (!%p779_p10)  }
  0xba   :  { %164 = dma.hbm_to_vmem [thread:$0]  %s151_s30, 16, %s1030_s8, [#allocation3 + $0x6] }
  0xbb   :  { %s480_s12 = sld [smem:[#allocation7 + $0x7]]  ;;  %s783_s29 = scalar_lea.hbm %s1114_s4, 1024 }
  0xbc   :  { %p784_p11 = scmp.ne.s32.totalorder %s1114_s4, %s783_s29  ;;  %p787_p12 = scmp.lt.u32.totalorder %s783_s29, %s1114_s4 }
  0xbe   :  { %p789_p13 = pnand %p787_p12, %p784_p11 }
  0xc0   :  { %792 = shalt.err (!%p789_p13)  }
  0xc1   :  { %s793_s19 = scalar_lea.vmem %s46_s9, 1024  ;;  %p798_p1 = scmp.lt.s32.totalorder %s46_s9, %s46_s9 }
  0xc2   :  { %p794_p0 = scmp.ne.s32.totalorder %s46_s9, %s793_s19  ;;  %p799_p2 = scmp.lt.s32.totalorder %s793_s19, %s793_s19 }
  0xc4   :  { %p800_p3 = por %p799_p2, %p798_p1 }
  0xc6   :  { %p801_p4 = pnand %p800_p3, %p794_p0 }
  0xc8   :  { %804 = shalt.err (!%p801_p4)  }
  0xc9   :  { %48 = dma.hbm_to_vmem [thread:$0]  %s1114_s4, 1024, %s46_s9, [#allocation5] }
  0xca   :  { %s887_s28 = smov [#allocation2 + $0x7]   ;;  %s481_s23 = sshll.u32 %s480_s12, 4 }
  0xcb   :  { %s178_s21 = sshll.u32 %s887_s28, 4  ;;  %s168_s30 = scalar_lea.hbm %s1111_s1, %s481_s23  ;;  %s179_s21 = int_to_ptr.vmem [resolvable:$true] %s178_s21 }
  0xcc   :  { %s805_s26 = scalar_lea.hbm %s168_s30, 16  ;;  %p808_p6 = scmp.lt.u32.totalorder %s168_s30, %s1111_s1 }
  0xcd   :  { %p806_p5 = scmp.ne.s32.totalorder %s168_s30, %s805_s26  ;;  %p809_p7 = scmp.lt.u32.totalorder %s971_s15, %s805_s26 }
  0xce   :  { %p811_p9 = scmp.lt.u32.totalorder %s805_s26, %s168_s30 }
  0xcf   :  { %p810_p8 = por %p809_p7, %p808_p6 }
  0xd1   :  { %p812_p10 = por %p811_p9, %p810_p8 }
  0xd3   :  { %p813_p11 = pnand %p812_p10, %p806_p5 }
  0xd5   :  { %816 = shalt.err (!%p813_p11)  }
  0xd6   :  { %s817_s4 = scalar_lea.vmem %s179_s21, 16  ;;  %p822_p13 = scmp.lt.s32.totalorder %s179_s21, %s950_s22 }
  0xd7   :  { %p818_p12 = scmp.ne.s32.totalorder %s179_s21, %s817_s4  ;;  %p823_p0 = scmp.lt.s32.totalorder %s980_s18, %s817_s4 }
  0xd9   :  { %p824_p1 = por %p823_p0, %p822_p13 }
  0xdb   :  { %p825_p2 = pnand %p824_p1, %p818_p12 }
  0xdd   :  { %828 = shalt.err (!%p825_p2)  }
  0xde   :  { %181 = dma.hbm_to_vmem [thread:$0]  %s168_s30, 16, %s179_s21, [#allocation3 + $0x7] }
  0xdf   :  { %855 = dma.done.wait [#allocation3], 16 }
  0xe0   :  { %856 = vsyncadd [#allocation3], 4294967280 }
  0xe1   :  { %857 = dma.done.wait [#allocation3 + $0x1], 16 }
  0xe2   :  { %858 = vsyncadd [#allocation3 + $0x1], 4294967280 }
  0xe3   :  { %859 = dma.done.wait [#allocation3 + $0x2], 16 }
  0xe4   :  { %860 = vsyncadd [#allocation3 + $0x2], 4294967280 }
  0xe5   :  { %861 = dma.done.wait [#allocation3 + $0x3], 16 }
  0xe6   :  { %862 = vsyncadd [#allocation3 + $0x3], 4294967280 }
  0xe7   :  { %863 = dma.done.wait [#allocation3 + $0x4], 16 }
  0xe8   :  { %864 = vsyncadd [#allocation3 + $0x4], 4294967280 }
  0xe9   :  { %865 = dma.done.wait [#allocation3 + $0x5], 16 }
  0xea   :  { %866 = vsyncadd [#allocation3 + $0x5], 4294967280 }
  0xeb   :  { %867 = dma.done.wait [#allocation3 + $0x6], 16 }
  0xec   :  { %868 = vsyncadd [#allocation3 + $0x6], 4294967280 }
  0xed   :  { %869 = dma.done.wait [#allocation3 + $0x7], 16 }
  0xee   :  { %870 = vsyncadd [#allocation3 + $0x7], 4294967280  ;;  %v888_v0 = vmov 0.0   ;;  %vm889_vm0 = vmmov 0   ;;  %v575_v1 = vld [vmem:[#allocation8] sm:$0xff]   ;;  %v576_v2 = vld [vmem:[#allocation8 + $0x8] sm:$0xff]  }
  0xef   :  { %519 = vmatprep.subr.bf16.mxu0 %v888_v0  ;;  %535 = vmatprep.mubr.msk.bf16.mxu0 %vm889_vm0, %v888_v0  ;;  %v577_v3 = vld [vmem:[#allocation8 + $0x10] sm:$0xff]   ;;  %v578_v4 = vld [vmem:[#allocation8 + $0x18] sm:$0xff]   ;;  %v579_v5 = vld [vmem:[#allocation8 + $0x20] sm:$0xff]  }
  0xf0   :  { %520 = vmatpush3.bf16.msra.mxu0 %v575_v1  ;;  %v580_v6 = vld [vmem:[#allocation8 + $0x28] sm:$0xff]   ;;  %v581_v7 = vld [vmem:[#allocation8 + $0x30] sm:$0xff]   ;;  %v582_v8 = vld [vmem:[#allocation8 + $0x38] sm:$0xff]  }
  0xf1   :  { %521 = vmatprep.subr.bf16.mxu0 %v888_v0  ;;  %v199_v9 = vld [vmem:[#allocation2] sm:$0xff] }
  0xf2   :  { %v200_v10 = vpack.c.bf16 %v199_v9, %v199_v9  ;;  %v482_v11 = vld [vmem:[%s1113_s3] ss:$0 sm:$0xff] }
  0xf4   :  { %522 = vmatpush3.bf16.msra.mxu0 %v576_v2 }
  0xf5   :  { %523 = vmatprep.subr.bf16.mxu0 %v888_v0 }
  0xf8   :  { %524 = vmatpush3.bf16.msra.mxu0 %v577_v3 }
  0xf9   :  { %525 = vmatprep.subr.bf16.mxu0 %v888_v0 }
  0xfc   :  { %526 = vmatpush3.bf16.msra.mxu0 %v578_v4 }
  0xfd   :  { %527 = vmatprep.subr.bf16.mxu0 %v888_v0 }
 0x100   :  { %528 = vmatpush3.bf16.msra.mxu0 %v579_v5 }
 0x101   :  { %529 = vmatprep.subr.bf16.mxu0 %v888_v0 }
 0x104   :  { %530 = vmatpush3.bf16.msra.mxu0 %v580_v6 }
 0x105   :  { %531 = vmatprep.subr.bf16.mxu0 %v888_v0 }
 0x108   :  { %532 = vmatpush3.bf16.msra.mxu0 %v581_v7 }
 0x109   :  { %533 = vmatprep.subr.bf16.mxu0 %v888_v0 }
 0x10c   :  { %534 = vmatpush3.bf16.msra.mxu0 %v582_v8 }
 0x10f   :  { %536 = vmatmul.mubr.bf16.vlgmr.msra.gmra.mrb[0].mxu0 %v200_v10 }
 0x1e2   :  { %v306_v12 = vpop.f32.mrb[0].mxu0 }
 0x1e3   :  { %v307_v13 = vadd.f32 %v482_v11, %v306_v12  ;;  %v537_v14 = vpop.f32.mrb[1].mxu0 }
 0x1e4   :  { %v309_v15 = vpop.f32.mrb[2].mxu0 }
 0x1e5   :  { %v312_v16 = vmax.f32 %v307_v13, 0.0  ;;  %v538_v17 = vpop.f32.mrb[3].mxu0 }
 0x1e6   :  { %871 = dma.done.wait [#allocation5], 1024 }
 0x1e7   :  { %872 = vsyncadd [#allocation5], 4294966272  ;;  %539 = vmatprep.subr.bf16.mxu1 %v888_v0  ;;  %555 = vmatprep.mubr.msk.bf16.mxu1 %vm889_vm0, %v888_v0  ;;  %v318_v18 = vld [vmem:[#allocation4] sm:$0xff]  ;;  %v319_v19 = vld [vmem:[#allocation4 + $0x8] sm:$0xff]  ;;  %v317_v26 = vpack.c.bf16 %v312_v16, %v312_v16  ;;  %s890_s18 = smov [#allocation11]  }
 0x1e8   :  { %540 = vmatpush3.bf16.msra.mxu1 %v318_v18  ;;  %v320_v20 = vld [vmem:[#allocation4 + $0x10] sm:$0xff]  ;;  %v321_v21 = vld [vmem:[#allocation4 + $0x18] sm:$0xff]  ;;  %v322_v22 = vld [vmem:[#allocation4 + $0x20] sm:$0xff]  ;;  %s381_s9 = sshll.u32 %s890_s18, 4  ;;  %s382_s9 = int_to_ptr.vmem [resolvable:$true] %s381_s9 }
 0x1e9   :  { %541 = vmatprep.subr.bf16.mxu1 %v888_v0  ;;  %v323_v23 = vld [vmem:[#allocation4 + $0x28] sm:$0xff]  ;;  %v324_v24 = vld [vmem:[#allocation4 + $0x30] sm:$0xff]  ;;  %v325_v25 = vld [vmem:[#allocation4 + $0x38] sm:$0xff]  ;;  %s829_s11 = scalar_lea.vmem %s382_s9, 128  ;;  %p834_p4 = scmp.lt.s32.totalorder %s382_s9, %s382_s9 }
 0x1ea   :  { %v491_v27 = vld [vmem:[%s1115_s5] ss:$0 sm:$0xff]  ;;  %p830_p3 = scmp.ne.s32.totalorder %s382_s9, %s829_s11  ;;  %p835_p5 = scmp.lt.s32.totalorder %s829_s11, %s829_s11 }
 0x1ec   :  { %542 = vmatpush3.bf16.msra.mxu1 %v319_v19  ;;  %p836_p6 = por %p835_p5, %p834_p4 }
 0x1ed   :  { %543 = vmatprep.subr.bf16.mxu1 %v888_v0 }
 0x1ee   :  { %p837_p7 = pnand %p836_p6, %p830_p3 }
 0x1f0   :  { %544 = vmatpush3.bf16.msra.mxu1 %v320_v20 }
 0x1f1   :  { %545 = vmatprep.subr.bf16.mxu1 %v888_v0 }
 0x1f4   :  { %546 = vmatpush3.bf16.msra.mxu1 %v321_v21 }
 0x1f5   :  { %547 = vmatprep.subr.bf16.mxu1 %v888_v0 }
 0x1f8   :  { %548 = vmatpush3.bf16.msra.mxu1 %v322_v22 }
 0x1f9   :  { %549 = vmatprep.subr.bf16.mxu1 %v888_v0 }
 0x1fc   :  { %550 = vmatpush3.bf16.msra.mxu1 %v323_v23 }
 0x1fd   :  { %551 = vmatprep.subr.bf16.mxu1 %v888_v0 }
 0x200   :  { %552 = vmatpush3.bf16.msra.mxu1 %v324_v24 }
 0x201   :  { %553 = vmatprep.subr.bf16.mxu1 %v888_v0 }
 0x204   :  { %554 = vmatpush3.bf16.msra.mxu1 %v325_v25 }
 0x207   :  { %556 = vmatmul.mubr.bf16.vlgmr.msra.gmra.mrb[0].mxu1 %v317_v26 }
 0x2da   :  { %v367_v28 = vpop.f32.mrb[0].mxu1 }
 0x2db   :  { %v368_v29 = vadd.f32 %v491_v27, %v367_v28  ;;  %v557_v30 = vpop.f32.mrb[1].mxu1 }
 0x2dc   :  { %v370_v31 = vpop.f32.mrb[2].mxu1 }
 0x2dd   :  { %v373_v32 = vadd.f32 %v368_v29, %v199_v9  ;;  %v558_v33 = vpop.f32.mrb[3].mxu1 }
 0x2df   :  { %374 = vst [vmem:[#allocation11] sm:$0xff] %v373_v32 }
 0x2e0   :  { %840 = shalt.err (!%p837_p7)
}
 0x2e1   :  { %s841_s5 = scalar_lea.hbm %s1116_s6, 128 }
 0x2e2   :  { %p842_p8 = scmp.ne.s32.totalorder %s1116_s6, %s841_s5  ;;  %p845_p9 = scmp.lt.u32.totalorder %s841_s5, %s1116_s6 }
 0x2e4   :  { %p847_p10 = pnand %p845_p9, %p842_p8 }
 0x2e6   :  { %850 = shalt.err (!%p847_p10)
}
 0x2e7   :  { %384 = dma.vmem_to_hbm [thread:$0]  %s382_s9, 128, %s1116_s6, [#allocation10]  }
 0x2e8   :  { %873 = dma.done.wait [#allocation10], 128  }
 0x2e9   :  { %874 = vsyncadd [#allocation10], 4294967168 }
 0x2ea   :  { %388 = vsyncpa [#allocation9], 1 }
 0x2eb   :  { %389 = vsyncpa [#allocation10], 1 }
 0x2ec   :  { %390 = vsyncmov [#allocation3] }
 0x2ef   :  { %s391_s17 = vpop.sfrf %390 }
 0x2f0   :  { %p492_p11 = scmp.ne.s32.totalorder %s391_s17, 0 }
 0x2f2   :  { %395 = shalt.err (%p492_p11)  }
 0x2f3   :  { %397 = vsyncmov [#allocation3 + $0x1] }
 0x2f6   :  { %s398_s19 = vpop.sfrf %397 }
 0x2f7   :  { %p493_p12 = scmp.ne.s32.totalorder %s398_s19, 0 }
 0x2f9   :  { %402 = shalt.err (%p493_p12)  }
 0x2fa   :  { %404 = vsyncmov [#allocation3 + $0x2] }
 0x2fd   :  { %s405_s8 = vpop.sfrf %404 }
 0x2fe   :  { %p494_p13 = scmp.ne.s32.totalorder %s405_s8, 0 }
 0x300   :  { %409 = shalt.err (%p494_p13)  }
 0x301   :  { %411 = vsyncmov [#allocation3 + $0x3] }
 0x304   :  { %s412_s20 = vpop.sfrf %411 }
 0x305   :  { %p495_p0 = scmp.ne.s32.totalorder %s412_s20, 0 }
 0x307   :  { %416 = shalt.err (%p495_p0)  }
 0x308   :  { %418 = vsyncmov [#allocation3 + $0x4] }
 0x30b   :  { %s419_s6 = vpop.sfrf %418 }
 0x30c   :  { %p496_p1 = scmp.ne.s32.totalorder %s419_s6, 0 }
 0x30e   :  { %423 = shalt.err (%p496_p1)  }
 0x30f   :  { %425 = vsyncmov [#allocation3 + $0x5] }
 0x312   :  { %s426_s28 = vpop.sfrf %425 }
 0x313   :  { %p497_p2 = scmp.ne.s32.totalorder %s426_s28, 0 }
 0x315   :  { %430 = shalt.err (%p497_p2)  }
 0x316   :  { %432 = vsyncmov [#allocation3 + $0x6] }
 0x319   :  { %s433_s21 = vpop.sfrf %432 }
 0x31a   :  { %p498_p3 = scmp.ne.s32.totalorder %s433_s21, 0 }
 0x31c   :  { %437 = shalt.err (%p498_p3)  }
 0x31d   :  { %439 = vsyncmov [#allocation3 + $0x7] }
 0x320   :  { %s440_s23 = vpop.sfrf %439 }
 0x321   :  { %p499_p4 = scmp.ne.s32.totalorder %s440_s23, 0 }
 0x323   :  { %444 = shalt.err (%p499_p4)  }
 0x324   :  { %445 = vsyncmov [#allocation5] }
 0x327   :  { %s446_s24 = vpop.sfrf %445 }
 0x328   :  { %p500_p5 = scmp.ne.s32.totalorder %s446_s24, 0 }
 0x32a   :  { %450 = shalt.err (%p500_p5)  }

</bundles_post_ra>
